<compile_context>
chip_gen: v6e
topology: v6e:2x2x1
jax: 0.10.0
libtpu: 0.0.40
codegen_flags: <defaults>
</compile_context>

<pallas_src>
import functools

import jax
import jax.numpy as jnp
from jax import lax
from jax.experimental import pallas as pl
from jax.experimental.pallas import tpu as pltpu


def _rolled_taps(z, *, K, H, W):
    """Stack the K*K circular-shift taps of z along the sublane (row) axis.

    z: (R, H*W) f32 where every row is one flattened (h, w) image plane.
    Returns (K*K*R, H*W) f32; row block t = dy*K + dx holds
    z[r, ((h + dy - p) % H) * W + (w + dx - p) % W].
    """
    R, F = z.shape
    assert F == H * W
    p = K // 2

    # Column (w) coordinate of every lane, for the W-wrap fix-up selects.
    col = lax.broadcasted_iota(jnp.int32, (R, F), 1) % W

    def shift_src(off):
        # result[r, f] = z[r, (f + off) % F]   (per-row circular shift, XLU rotate)
        amt = (-off) % F
        if amt == 0:
            return z
        return pltpu.roll(z, amt, 1)

    pieces = []
    for dy in range(K):
        sy = dy - p
        for dx in range(K):
            sx = dx - p
            s = sy * W + sx
            main = shift_src(s)
            if sx > 0:
                # w + sx overflowed the row for the last sx columns -> undo the row leak.
                tap = jnp.where(col >= W - sx, shift_src(s - W), main)
            elif sx < 0:
                tap = jnp.where(col < -sx, shift_src(s + W), main)
            else:
                tap = main
            pieces.append(tap)
    # Sublane-axis concat of row-aligned (R, F) blocks: no retiling.
    return jnp.concatenate(pieces, axis=0)


def fused_residual_kernel(x_ref, a1_ref, b1_ref, a2_ref, b2_ref, o_ref, *, K, H, W):
    # x_ref: (N*Cin, H*W); a*_ref: (N*Cout, K*K*N*Cin); b*_ref: (N*Cout, 1); o_ref like x_ref.
    x = x_ref[...].astype(jnp.float32)                                  # (R, F)

    # conv1 + bias + activation: one MXU matmul, h stays in VMEM in f32.
    taps1 = _rolled_taps(x, K=K, H=H, W=W)                              # (K*K*R, F)
    h = jnp.dot(a1_ref[...], taps1, preferred_element_type=jnp.float32) + b1_ref[...]
    h = jnp.maximum(h, 0.0)                                             # assumed ReLU

    # conv2 + bias + residual add, all without leaving VMEM.
    taps2 = _rolled_taps(h, K=K, H=H, W=W)
    y = jnp.dot(a2_ref[...], taps2, preferred_element_type=jnp.float32) + b2_ref[...]
    o_ref[...] = (x + y).astype(o_ref.dtype)


def _mixing_matrix(w_hwio, n_batch):
    """HWIO (K, K, Cin, Cout) weights -> (N*Cout, K*K*N*Cin) batch-block-diagonal matrix."""
    K, K2, cin, cout = w_hwio.shape
    assert K == K2
    w_taps = w_hwio.reshape(K * K, cin, cout).astype(jnp.float32)       # (t, ci, co)
    eye = jnp.eye(n_batch, dtype=jnp.float32)
    a = jnp.einsum("ab,tio->aotbi", eye, w_taps)                        # (N, Cout, KK, N, Cin)
    return a.reshape(n_batch * cout, K * K * n_batch * cin)


@jax.jit
def residual_block(x_nchw, w1, b1, w2, b2):
    """Forward pass of ResidualBlock. x_nchw: (N, C, H, W); w*: HWIO; b*: (Cout,)."""
    N, C, H, W = x_nchw.shape
    K = w1.shape[0]
    cmid = w1.shape[3]
    cout = w2.shape[3]
    assert w1.shape[2] == C and w2.shape[2] == cmid
    assert cout == C, "residual add requires in_ch == out_ch"

    F = H * W
    x2 = x_nchw.reshape(N * C, F)                       # contiguous -> free, lane-dense

    a1 = _mixing_matrix(w1, N)                          # (N*cmid, K*K*N*C)
    a2 = _mixing_matrix(w2, N)                          # (N*cout, K*K*N*cmid)
    b1c = jnp.tile(b1.astype(jnp.float32), N).reshape(N * cmid, 1)
    b2c = jnp.tile(b2.astype(jnp.float32), N).reshape(N * cout, 1)

    flops = 2 * F * (a1.size + a2.size)
    bytes_accessed = (x2.size + N * cout * F) * x_nchw.dtype.itemsize + 4 * (
        a1.size + a2.size + b1c.size + b2c.size)

    kernel = functools.partial(fused_residual_kernel, K=K, H=H, W=W)
    vmem = pl.BlockSpec(memory_space=pltpu.MemorySpace.VMEM)

    out2 = pl.pallas_call(
        kernel,
        out_shape=jax.ShapeDtypeStruct((N * cout, F), x_nchw.dtype),
        in_specs=[vmem, vmem, vmem, vmem, vmem],
        out_specs=vmem,
        compiler_params=pltpu.CompilerParams(vmem_limit_bytes=16 * 1024 * 1024),
        cost_estimate=pl.CostEstimate(
            flops=int(flops), transcendentals=0, bytes_accessed=int(bytes_accessed)),
    )(x2, a1, b1c, a2, b2c)

    return out2.reshape(N, cout, H, W)


def _reference(x_nchw, w1, b1, w2, b2):
    """Pure-JAX reference (lax.conv) mirroring the PyTorch module."""
    K = w1.shape[0]
    p = K // 2
    x = jnp.transpose(x_nchw, (0, 2, 3, 1))
    dn = lax.conv_dimension_numbers(x.shape, w1.shape, ("NHWC", "HWIO", "NHWC"))

    def conv(inp, w, b):
        inp_p = jnp.pad(inp, ((0, 0), (p, p), (p, p), (0, 0)), mode="wrap")
        y = lax.conv_general_dilated(inp_p, w, (1, 1), "VALID", dimension_numbers=dn)
        return y + b[None, None, None, :]

    h = jnp.maximum(conv(x, w1, b1), 0.0)
    out = x + conv(h, w2, b2)
    return jnp.transpose(out, (0, 3, 1, 2))


if __name__ == "__main__":
    # Small, ResidualBlock-consistent shapes (residual add requires in_ch == out_ch).
    N, C, H, W = 2, 4, 16, 16
    K = 3

    key = jax.random.PRNGKey(0)
    kx, kw1, kb1, kw2, kb2 = jax.random.split(key, 5)

    x = jax.random.normal(kx, (N, C, H, W), dtype=jnp.float32)
    fan_in = C * K * K
    w1 = jax.random.normal(kw1, (K, K, C, C), dtype=jnp.float32) / jnp.sqrt(fan_in)
    b1 = jax.random.normal(kb1, (C,), dtype=jnp.float32) * 0.01
    w2 = jax.random.normal(kw2, (K, K, C, C), dtype=jnp.float32) / jnp.sqrt(fan_in)
    b2 = jax.random.normal(kb2, (C,), dtype=jnp.float32) * 0.01

    out = jax.block_until_ready(residual_block(x, w1, b1, w2, b2))
    ref = jax.block_until_ready(_reference(x, w1, b1, w2, b2))

    assert out.shape == (N, C, H, W)
    assert jnp.allclose(out, ref, atol=1e-4, rtol=1e-4), "Pallas kernel mismatch vs JAX reference"

    print("KERNEL_OK")
</pallas_src>

<mosaic_0001>
module attributes {stable_mosaic.version = 11 : i64} {
  func.func @fused_residual_kernel(%arg0: memref<8x256xf32, #tpu.memory_space<vmem>>, %arg1: memref<8x72xf32, #tpu.memory_space<vmem>>, %arg2: memref<8x1xf32, #tpu.memory_space<vmem>>, %arg3: memref<8x72xf32, #tpu.memory_space<vmem>>, %arg4: memref<8x1xf32, #tpu.memory_space<vmem>>, %arg5: memref<8x256xf32, #tpu.memory_space<vmem>>) attributes {dimension_semantics = [], scalar_prefetch = 0 : i64, scratch_operands = 0 : i64, tpu.core_type = #tpu.core_type<tc>} {
    %c0 = arith.constant 0 : index
    %c0_0 = arith.constant 0 : index
    %0 = vector.load %arg0[%c0, %c0_0] : memref<8x256xf32, #tpu.memory_space<vmem>>, vector<8x256xf32>
    %1 = tpu.iota {dimensions = array<i32: 1>} : vector<8x256xi32>
    %c16_i32 = arith.constant 16 : i32
    %c0_i32 = arith.constant 0 : i32
    %2 = arith.cmpi eq, %c16_i32, %c0_i32 : i32
    %c1_i32 = arith.constant 1 : i32
    %3 = arith.select %2, %c1_i32, %c16_i32 : i32
    %4 = vector.broadcast %3 : i32 to vector<8x256xi32>
    %5 = arith.remsi %1, %4 : vector<8x256xi32>
    %c0_i32_1 = arith.constant 0 : i32
    %6 = vector.broadcast %c0_i32_1 : i32 to vector<8x256xi32>
    %7 = arith.cmpi ne, %5, %6 : vector<8x256xi32>
    %c0_i32_2 = arith.constant 0 : i32
    %8 = vector.broadcast %c0_i32_2 : i32 to vector<8x256xi32>
    %9 = arith.cmpi slt, %5, %8 : vector<8x256xi32>
    %c0_i32_3 = arith.constant 0 : i32
    %10 = arith.cmpi slt, %3, %c0_i32_3 : i32
    %11 = vector.broadcast %10 : i1 to vector<8x256xi1>
    %12 = vector.broadcast %11 : vector<8x256xi1> to vector<8x256xi1>
    %13 = arith.xori %9, %12 : vector<8x256xi1>
    %14 = arith.andi %13, %7 : vector<8x256xi1>
    %15 = vector.broadcast %3 : i32 to vector<8x256xi32>
    %16 = arith.addi %5, %15 : vector<8x256xi32>
    %17 = arith.select %14, %16, %5 : vector<8x256xi1>, vector<8x256xi32>
    %c17_i32 = arith.constant 17 : i32
    %18 = tpu.dynamic_rotate %0 by %c17_i32 dim 1 : vector<8x256xf32>, i32 -> vector<8x256xf32>
    %c1_i32_4 = arith.constant 1 : i32
    %19 = vector.broadcast %c1_i32_4 : i32 to vector<8x256xi32>
    %20 = arith.cmpi slt, %17, %19 : vector<8x256xi32>
    %c1_i32_5 = arith.constant 1 : i32
    %21 = tpu.dynamic_rotate %0 by %c1_i32_5 dim 1 : vector<8x256xf32>, i32 -> vector<8x256xf32>
    %22 = arith.select %20, %21, %18 : vector<8x256xi1>, vector<8x256xf32>
    %c16_i32_6 = arith.constant 16 : i32
    %23 = tpu.dynamic_rotate %0 by %c16_i32_6 dim 1 : vector<8x256xf32>, i32 -> vector<8x256xf32>
    %c15_i32 = arith.constant 15 : i32
    %24 = tpu.dynamic_rotate %0 by %c15_i32 dim 1 : vector<8x256xf32>, i32 -> vector<8x256xf32>
    %c15_i32_7 = arith.constant 15 : i32
    %25 = vector.broadcast %c15_i32_7 : i32 to vector<8x256xi32>
    %26 = arith.cmpi sge, %17, %25 : vector<8x256xi32>
    %c31_i32 = arith.constant 31 : i32
    %27 = tpu.dynamic_rotate %0 by %c31_i32 dim 1 : vector<8x256xf32>, i32 -> vector<8x256xf32>
    %28 = arith.select %26, %27, %24 : vector<8x256xi1>, vector<8x256xf32>
    %c1_i32_8 = arith.constant 1 : i32
    %29 = tpu.dynamic_rotate %0 by %c1_i32_8 dim 1 : vector<8x256xf32>, i32 -> vector<8x256xf32>
    %c1_i32_9 = arith.constant 1 : i32
    %30 = vector.broadcast %c1_i32_9 : i32 to vector<8x256xi32>
    %31 = arith.cmpi slt, %17, %30 : vector<8x256xi32>
    %c241_i32 = arith.constant 241 : i32
    %32 = tpu.dynamic_rotate %0 by %c241_i32 dim 1 : vector<8x256xf32>, i32 -> vector<8x256xf32>
    %33 = arith.select %31, %32, %29 : vector<8x256xi1>, vector<8x256xf32>
    %c255_i32 = arith.constant 255 : i32
    %34 = tpu.dynamic_rotate %0 by %c255_i32 dim 1 : vector<8x256xf32>, i32 -> vector<8x256xf32>
    %c15_i32_10 = arith.constant 15 : i32
    %35 = vector.broadcast %c15_i32_10 : i32 to vector<8x256xi32>
    %36 = arith.cmpi sge, %17, %35 : vector<8x256xi32>
    %c15_i32_11 = arith.constant 15 : i32
    %37 = tpu.dynamic_rotate %0 by %c15_i32_11 dim 1 : vector<8x256xf32>, i32 -> vector<8x256xf32>
    %38 = arith.select %36, %37, %34 : vector<8x256xi1>, vector<8x256xf32>
    %c241_i32_12 = arith.constant 241 : i32
    %39 = tpu.dynamic_rotate %0 by %c241_i32_12 dim 1 : vector<8x256xf32>, i32 -> vector<8x256xf32>
    %c1_i32_13 = arith.constant 1 : i32
    %40 = vector.broadcast %c1_i32_13 : i32 to vector<8x256xi32>
    %41 = arith.cmpi slt, %17, %40 : vector<8x256xi32>
    %c225_i32 = arith.constant 225 : i32
    %42 = tpu.dynamic_rotate %0 by %c225_i32 dim 1 : vector<8x256xf32>, i32 -> vector<8x256xf32>
    %43 = arith.select %41, %42, %39 : vector<8x256xi1>, vector<8x256xf32>
    %c240_i32 = arith.constant 240 : i32
    %44 = tpu.dynamic_rotate %0 by %c240_i32 dim 1 : vector<8x256xf32>, i32 -> vector<8x256xf32>
    %c239_i32 = arith.constant 239 : i32
    %45 = tpu.dynamic_rotate %0 by %c239_i32 dim 1 : vector<8x256xf32>, i32 -> vector<8x256xf32>
    %c15_i32_14 = arith.constant 15 : i32
    %46 = vector.broadcast %c15_i32_14 : i32 to vector<8x256xi32>
    %47 = arith.cmpi sge, %17, %46 : vector<8x256xi32>
    %c255_i32_15 = arith.constant 255 : i32
    %48 = tpu.dynamic_rotate %0 by %c255_i32_15 dim 1 : vector<8x256xf32>, i32 -> vector<8x256xf32>
    %49 = arith.select %47, %48, %45 : vector<8x256xi1>, vector<8x256xf32>
    %50 = tpu.concatenate %22, %23, %28, %33, %0, %38, %43, %44, %49 in 0 : vector<8x256xf32>, vector<8x256xf32>, vector<8x256xf32>, vector<8x256xf32>, vector<8x256xf32>, vector<8x256xf32>, vector<8x256xf32>, vector<8x256xf32>, vector<8x256xf32> -> vector<72x256xf32>
    %c0_16 = arith.constant 0 : index
    %c0_17 = arith.constant 0 : index
    %51 = vector.load %arg1[%c0_16, %c0_17] : memref<8x72xf32, #tpu.memory_space<vmem>>, vector<8x72xf32>
    %cst = arith.constant dense<0.000000e+00> : vector<8x256xf32>
    %52 = tpu.matmul %51, %50, %cst {dimension_numbers = #tpu.dot_dimension_numbers<[1], [0], [0], [1], [0, 0, 1, 1], [], []>} : vector<8x72xf32>, vector<72x256xf32>, vector<8x256xf32> -> vector<8x256xf32>
    %c0_18 = arith.constant 0 : index
    %c0_19 = arith.constant 0 : index
    %53 = vector.load %arg2[%c0_18, %c0_19] : memref<8x1xf32, #tpu.memory_space<vmem>>, vector<8x1xf32>
    %54 = vector.broadcast %53 : vector<8x1xf32> to vector<8x256xf32>
    %55 = arith.addf %52, %54 : vector<8x256xf32>
    %cst_20 = arith.constant 0.000000e+00 : f32
    %56 = vector.broadcast %cst_20 : f32 to vector<8x256xf32>
    %57 = arith.maximumf %55, %56 : vector<8x256xf32>
    %58 = tpu.iota {dimensions = array<i32: 1>} : vector<8x256xi32>
    %c16_i32_21 = arith.constant 16 : i32
    %c0_i32_22 = arith.constant 0 : i32
    %59 = arith.cmpi eq, %c16_i32_21, %c0_i32_22 : i32
    %c1_i32_23 = arith.constant 1 : i32
    %60 = arith.select %59, %c1_i32_23, %c16_i32_21 : i32
    %61 = vector.broadcast %60 : i32 to vector<8x256xi32>
    %62 = arith.remsi %58, %61 : vector<8x256xi32>
    %c0_i32_24 = arith.constant 0 : i32
    %63 = vector.broadcast %c0_i32_24 : i32 to vector<8x256xi32>
    %64 = arith.cmpi ne, %62, %63 : vector<8x256xi32>
    %c0_i32_25 = arith.constant 0 : i32
    %65 = vector.broadcast %c0_i32_25 : i32 to vector<8x256xi32>
    %66 = arith.cmpi slt, %62, %65 : vector<8x256xi32>
    %c0_i32_26 = arith.constant 0 : i32
    %67 = arith.cmpi slt, %60, %c0_i32_26 : i32
    %68 = vector.broadcast %67 : i1 to vector<8x256xi1>
    %69 = vector.broadcast %68 : vector<8x256xi1> to vector<8x256xi1>
    %70 = arith.xori %66, %69 : vector<8x256xi1>
    %71 = arith.andi %70, %64 : vector<8x256xi1>
    %72 = vector.broadcast %60 : i32 to vector<8x256xi32>
    %73 = arith.addi %62, %72 : vector<8x256xi32>
    %74 = arith.select %71, %73, %62 : vector<8x256xi1>, vector<8x256xi32>
    %c17_i32_27 = arith.constant 17 : i32
    %75 = tpu.dynamic_rotate %57 by %c17_i32_27 dim 1 : vector<8x256xf32>, i32 -> vector<8x256xf32>
    %c1_i32_28 = arith.constant 1 : i32
    %76 = vector.broadcast %c1_i32_28 : i32 to vector<8x256xi32>
    %77 = arith.cmpi slt, %74, %76 : vector<8x256xi32>
    %c1_i32_29 = arith.constant 1 : i32
    %78 = tpu.dynamic_rotate %57 by %c1_i32_29 dim 1 : vector<8x256xf32>, i32 -> vector<8x256xf32>
    %79 = arith.select %77, %78, %75 : vector<8x256xi1>, vector<8x256xf32>
    %c16_i32_30 = arith.constant 16 : i32
    %80 = tpu.dynamic_rotate %57 by %c16_i32_30 dim 1 : vector<8x256xf32>, i32 -> vector<8x256xf32>
    %c15_i32_31 = arith.constant 15 : i32
    %81 = tpu.dynamic_rotate %57 by %c15_i32_31 dim 1 : vector<8x256xf32>, i32 -> vector<8x256xf32>
    %c15_i32_32 = arith.constant 15 : i32
    %82 = vector.broadcast %c15_i32_32 : i32 to vector<8x256xi32>
    %83 = arith.cmpi sge, %74, %82 : vector<8x256xi32>
    %c31_i32_33 = arith.constant 31 : i32
    %84 = tpu.dynamic_rotate %57 by %c31_i32_33 dim 1 : vector<8x256xf32>, i32 -> vector<8x256xf32>
    %85 = arith.select %83, %84, %81 : vector<8x256xi1>, vector<8x256xf32>
    %c1_i32_34 = arith.constant 1 : i32
    %86 = tpu.dynamic_rotate %57 by %c1_i32_34 dim 1 : vector<8x256xf32>, i32 -> vector<8x256xf32>
    %c1_i32_35 = arith.constant 1 : i32
    %87 = vector.broadcast %c1_i32_35 : i32 to vector<8x256xi32>
    %88 = arith.cmpi slt, %74, %87 : vector<8x256xi32>
    %c241_i32_36 = arith.constant 241 : i32
    %89 = tpu.dynamic_rotate %57 by %c241_i32_36 dim 1 : vector<8x256xf32>, i32 -> vector<8x256xf32>
    %90 = arith.select %88, %89, %86 : vector<8x256xi1>, vector<8x256xf32>
    %c255_i32_37 = arith.constant 255 : i32
    %91 = tpu.dynamic_rotate %57 by %c255_i32_37 dim 1 : vector<8x256xf32>, i32 -> vector<8x256xf32>
    %c15_i32_38 = arith.constant 15 : i32
    %92 = vector.broadcast %c15_i32_38 : i32 to vector<8x256xi32>
    %93 = arith.cmpi sge, %74, %92 : vector<8x256xi32>
    %c15_i32_39 = arith.constant 15 : i32
    %94 = tpu.dynamic_rotate %57 by %c15_i32_39 dim 1 : vector<8x256xf32>, i32 -> vector<8x256xf32>
    %95 = arith.select %93, %94, %91 : vector<8x256xi1>, vector<8x256xf32>
    %c241_i32_40 = arith.constant 241 : i32
    %96 = tpu.dynamic_rotate %57 by %c241_i32_40 dim 1 : vector<8x256xf32>, i32 -> vector<8x256xf32>
    %c1_i32_41 = arith.constant 1 : i32
    %97 = vector.broadcast %c1_i32_41 : i32 to vector<8x256xi32>
    %98 = arith.cmpi slt, %74, %97 : vector<8x256xi32>
    %c225_i32_42 = arith.constant 225 : i32
    %99 = tpu.dynamic_rotate %57 by %c225_i32_42 dim 1 : vector<8x256xf32>, i32 -> vector<8x256xf32>
    %100 = arith.select %98, %99, %96 : vector<8x256xi1>, vector<8x256xf32>
    %c240_i32_43 = arith.constant 240 : i32
    %101 = tpu.dynamic_rotate %57 by %c240_i32_43 dim 1 : vector<8x256xf32>, i32 -> vector<8x256xf32>
    %c239_i32_44 = arith.constant 239 : i32
    %102 = tpu.dynamic_rotate %57 by %c239_i32_44 dim 1 : vector<8x256xf32>, i32 -> vector<8x256xf32>
    %c15_i32_45 = arith.constant 15 : i32
    %103 = vector.broadcast %c15_i32_45 : i32 to vector<8x256xi32>
    %104 = arith.cmpi sge, %74, %103 : vector<8x256xi32>
    %c255_i32_46 = arith.constant 255 : i32
    %105 = tpu.dynamic_rotate %57 by %c255_i32_46 dim 1 : vector<8x256xf32>, i32 -> vector<8x256xf32>
    %106 = arith.select %104, %105, %102 : vector<8x256xi1>, vector<8x256xf32>
    %107 = tpu.concatenate %79, %80, %85, %90, %57, %95, %100, %101, %106 in 0 : vector<8x256xf32>, vector<8x256xf32>, vector<8x256xf32>, vector<8x256xf32>, vector<8x256xf32>, vector<8x256xf32>, vector<8x256xf32>, vector<8x256xf32>, vector<8x256xf32> -> vector<72x256xf32>
    %c0_47 = arith.constant 0 : index
    %c0_48 = arith.constant 0 : index
    %108 = vector.load %arg3[%c0_47, %c0_48] : memref<8x72xf32, #tpu.memory_space<vmem>>, vector<8x72xf32>
    %cst_49 = arith.constant dense<0.000000e+00> : vector<8x256xf32>
    %109 = tpu.matmul %108, %107, %cst_49 {dimension_numbers = #tpu.dot_dimension_numbers<[1], [0], [0], [1], [0, 0, 1, 1], [], []>} : vector<8x72xf32>, vector<72x256xf32>, vector<8x256xf32> -> vector<8x256xf32>
    %c0_50 = arith.constant 0 : index
    %c0_51 = arith.constant 0 : index
    %110 = vector.load %arg4[%c0_50, %c0_51] : memref<8x1xf32, #tpu.memory_space<vmem>>, vector<8x1xf32>
    %111 = vector.broadcast %110 : vector<8x1xf32> to vector<8x256xf32>
    %112 = arith.addf %109, %111 : vector<8x256xf32>
    %113 = arith.addf %0, %112 : vector<8x256xf32>
    %c0_52 = arith.constant 0 : index
    %c0_53 = arith.constant 0 : index
    %114 = vector.load %arg5[%c0_52, %c0_53] : memref<8x256xf32, #tpu.memory_space<vmem>>, vector<8x256xf32>
    tpu.vector_store %arg5[%c0_52, %c0_53], %113 {strides = array<i32>} : memref<8x256xf32, #tpu.memory_space<vmem>>, vector<8x256xf32>,
    return
  }
}

</mosaic_0001>

<bundles_post_ra>
// kernel: tile.13
= control target key start
LH: loop header
LB: loop body
LE: loop exit
PB: predicated region body
PF: predicated region fallthrough
CT: control target
= control target key end

     0   :  { %s22_s0 = inlined_call_operand.vmem [shape: f32[4], index: 0, kind: input, shape index: {}]   ;;  %s23_s1 = inlined_call_operand.vmem [shape: f32[2,4], index: 1, kind: output, shape index: {}]  }
   0x1   :  { %v4_v0 = vld [vmem:[%s22_s0] ss:$0 sm:$0xff] }
   0x2   :  { %5 = vst [vmem:[%s23_s1] sm:$0x3] %v4_v0 }

// kernel: tile.0
= control target key start
LH: loop header
LB: loop body
LE: loop exit
PB: predicated region body
PF: predicated region fallthrough
CT: control target
= control target key end

     0   :  { %s35_s8 = smov 125   ;;  %vm8_vm0 = vcmask 7168   ;;  %s36_s11 = smov 126   ;;  %s62_s0 = inlined_call_operand.vmem [shape: f32[2,4], index: 0, kind: input, shape index: {}]   ;;  %s63_s1 = inlined_call_operand.vmem [shape: f32[8,1], index: 1, kind: output, shape index: {}]  }
   0x1   :  { %v5_v0 = vld [vmem:[%s62_s0] sm:$0x3]  ;;  %s34_s0 = smov 127  }
   0x2   :  { %6 = vst [vmem:[#allocation0] sm:$0x3] %v5_v0 }
   0x9   :  { %v10_v1 = vld [vmem:[#allocation0] sm:$0x3]  }
   0xa   :  { %v22_v2 = vld [vmem:[#allocation0] sm:$0x3]   ;;  %11 = vrot.lane.b32.xlu0 %v10_v1, %s34_s0 }
   0xb   :  { %23 = vrot.lane.b32.xlu1 %v22_v2, %s35_s8  ;;  %v7_v3 = vld [vmem:[#allocation0] sm:$0x3]  }
   0xc   :  { %v16_v4 = vld [vmem:[#allocation0] sm:$0x3]   ;;  %9 = vst.msk [vmem:[%s63_s1] ss:$4 sm:$0x3] %vm8_vm0, %v7_v3  }
   0xe   :  { %17 = vrot.lane.b32.xlu0 %v16_v4, %s36_s11 }
  0x7c   :  { %v12_v5 = vpop.permute.xlu0 %11  }
  0x7d   :  { %v24_v6 = vpop.permute.xlu1 %23   ;;  %28 = vst.msk [vmem:[%s63_s1 + $0x1] ss:$4 sm:$0x3] %vm8_vm0, %v12_v5  }
  0x7e   :  { %30 = vst.msk [vmem:[%s63_s1 + $0x3] ss:$4 sm:$0x3] %vm8_vm0, %v24_v6  }
  0x80   :  { %v18_v7 = vpop.permute.xlu0 %17  }
  0x81   :  { %29 = vst.msk [vmem:[%s63_s1 + $0x2] ss:$4 sm:$0x3] %vm8_vm0, %v18_v7  }

// kernel: residual_block.1
= control target key start
LH: loop header
LB: loop body
LE: loop exit
PB: predicated region body
PF: predicated region fallthrough
CT: control target
= control target key end

     0   :  { %s395_s20 = smov 111   ;;  %s396_s21 = smov 127   ;;  %v402_v2 = vmov 0.0   ;;  %v404_v3 = vmov 0   ;;  %v22_v5 = vlaneseq  ;;  %vm142_vm14 = vcmask 588800   ;;  %s715_s0 = inlined_call_operand.vmem [shape: f32[8,256], index: 0, kind: input, shape index: {}]   ;;  %s716_s2 = inlined_call_operand.vmem [shape: f32[8,1], index: 2, kind: input, shape index: {}]   ;;  %s717_s1 = inlined_call_operand.vmem [shape: f32[8,72], index: 1, kind: input, shape index: {}]   ;;  %s718_s4 = inlined_call_operand.vmem [shape: f32[8,1], index: 4, kind: input, shape index: {}]   ;;  %s719_s3 = inlined_call_operand.vmem [shape: f32[8,72], index: 3, kind: input, shape index: {}]   ;;  %s720_s5 = inlined_call_operand.vmem [shape: f32[8,256], index: 5, kind: output, shape index: {}]  }
   0x1   :  { %v440_v0 = vld [vmem:[%s715_s0] sm:$0xff]  ;;  %v449_v1 = vld [vmem:[%s715_s0 + $0x8] sm:$0xff]  ;;  %s397_s24 = smov 112   ;;  %s398_s25 = smov 113   ;;  %210 = vmatprep.mubr.f32.mxu0 %v402_v2  ;;  %365 = vmatprep.mubr.f32.mxu1 %v402_v2 }
   0x2   :  { %126 = vrot.lane.b32.xlu1 %v440_v0, %s395_s20  ;;  %101 = vrot.lane.b32.xlu0 %v440_v0, %s396_s21  ;;  %s399_s0 = smov 97   ;;  %s400_s26 = smov 15   ;;  %v136_v4 = vld [vmem:[%s716_s2] sm:$0xff]  ;;  %v490_v6 = vand.u32 127, %v22_v5 }
   0x3   :  { %s401_s27 = smov 1   ;;  %s403_s28 = smov 31   ;;  %394 = vset.pattern.permute.xlu0 %v404_v3 }
   0x4   :  { %s405_s29 = smov 16   ;;  %s406_s30 = smov 17   ;;  %v24_v7 = vadd.s32 128, %v490_v6  ;;  %v29_v9 = vand.u32 15, %v490_v6  ;;  %vm130_vm0 = vcmp.lt.s32.totalorder %v490_v6, 111  ;;  %vm105_vm1 = vcmp.lt.s32.totalorder %v490_v6, 127 }
   0x5   :  { %vm123_vm4 = vcmp.lt.s32.totalorder %v490_v6, 112  ;;  %vm96_vm5 = vcmp.lt.s32.totalorder %v490_v6, 113  ;;  %vm114_vm6 = vcmp.lt.s32.totalorder %v490_v6, 97  ;;  %vm78_vm9 = vcmp.lt.s32.totalorder %v490_v6, 15 }
   0x6   :  { %128 = vrot.lane.b32.xlu1 %v449_v1, %s395_s20  ;;  %103 = vrot.lane.b32.xlu0 %v449_v1, %s396_s21  ;;  %v36_v8 = vand.u32 15, %v24_v7  ;;  %vm500_vm3 = vcmp.ge.s32.totalorder %v29_v9, 15  ;;  %vm527_vm8 = vcmp.lt.s32.totalorder %v29_v9, 1  ;;  %vm62_vm10 = vcmp.lt.s32.totalorder %v490_v6, 1 }
   0x7   :  { %vm87_vm11 = vcmp.lt.s32.totalorder %v490_v6, 31  ;;  %vm71_vm12 = vcmp.lt.s32.totalorder %v490_v6, 16  ;;  %vm53_vm13 = vcmp.lt.s32.totalorder %v490_v6, 17 }
   0x8   :  { %vm496_vm2 = vcmp.ge.s32.totalorder %v36_v8, 15  ;;  %vm523_vm7 = vcmp.lt.s32.totalorder %v36_v8, 1 }
   0xa   :  { %121 = vrot.lane.b32.xlu1 %v449_v1, %s397_s24  ;;  %119 = vrot.lane.b32.xlu0 %v440_v0, %s397_s24 }
   0xe   :  { %94 = vrot.lane.b32.xlu1 %v449_v1, %s398_s25  ;;  %92 = vrot.lane.b32.xlu0 %v440_v0, %s398_s25 }
  0x12   :  { %112 = vrot.lane.b32.xlu1 %v449_v1, %s399_s0  ;;  %110 = vrot.lane.b32.xlu0 %v440_v0, %s399_s0 }
  0x16   :  { %76 = vrot.lane.b32.xlu1 %v449_v1, %s400_s26  ;;  %74 = vrot.lane.b32.xlu0 %v440_v0, %s400_s26 }
  0x1a   :  { %60 = vrot.lane.b32.xlu1 %v449_v1, %s401_s27  ;;  %58 = vrot.lane.b32.xlu0 %v440_v0, %s401_s27 }
  0x1e   :  { %85 = vrot.lane.b32.xlu1 %v449_v1, %s403_s28  ;;  %83 = vrot.lane.b32.xlu0 %v440_v0, %s403_s28 }
  0x22   :  { %69 = vrot.lane.b32.xlu1 %v449_v1, %s405_s29  ;;  %67 = vrot.lane.b32.xlu0 %v440_v0, %s405_s29 }
  0x26   :  { %51 = vrot.lane.b32.xlu1 %v449_v1, %s406_s30  ;;  %49 = vrot.lane.b32.xlu0 %v440_v0, %s406_s30 }
  0x2a   :  { %139 = vperm.xlu0 %394, %v136_v4   ;;  %v135_v4 = vld [vmem:[%s717_s1] sm:$0xff] }
  0x74   :  { %v127_v10 = vpop.permute.xlu1 %126  ;;  %v102_v11 = vpop.permute.xlu0 %101 }
  0x78   :  { %v129_v14 = vpop.permute.xlu1 %128  ;;  %v104_v15 = vpop.permute.xlu0 %103 }
  0x79   :  { %v131_v16 = vsel %vm130_vm0, %v127_v10, %v129_v14  ;;  %v132_v17 = vsel %vm130_vm0, %v129_v14, %v127_v10  ;;  %v106_v18 = vsel %vm105_vm1, %v102_v11, %v104_v15  ;;  %v107_v19 = vsel %vm105_vm1, %v104_v15, %v102_v11  ;;  %v292_v15 = vld [vmem:[%s718_s4] sm:$0xff] }
  0x7a   :  { %v134_v20 = vsel %vm496_vm2, %v107_v19, %v132_v17  ;;  %v133_v21 = vsel %vm500_vm3, %v106_v18, %v131_v16 }
  0x7b   :  { %160 = vmatprep.subr.mxu0 %v134_v20 }
  0x7c   :  { %v122_v22 = vpop.permute.xlu1 %121  ;;  %161 = vmatpush1.msra.mxu0 %v133_v21  ;;  %v120_v23 = vpop.permute.xlu0 %119 }
  0x7d   :  { %v125_v24 = vsel %vm123_vm4, %v122_v22, %v120_v23  ;;  %v124_v25 = vsel %vm123_vm4, %v120_v23, %v122_v22 }
  0x7e   :  { %162 = vmatprep.subr.mxu0 %v125_v24 }
  0x7f   :  { %163 = vmatpush1.msra.mxu0 %v124_v25 }
  0x80   :  { %v95_v26 = vpop.permute.xlu1 %94  ;;  %v93_v27 = vpop.permute.xlu0 %92 }
  0x81   :  { %v97_v32 = vsel %vm96_vm5, %v93_v27, %v95_v26  ;;  %v98_v33 = vsel %vm96_vm5, %v95_v26, %v93_v27 }
  0x84   :  { %v113_v30 = vpop.permute.xlu1 %112  ;;  %v111_v31 = vpop.permute.xlu0 %110 }
  0x85   :  { %v115_v34 = vsel %vm114_vm6, %v111_v31, %v113_v30  ;;  %v116_v35 = vsel %vm114_vm6, %v113_v30, %v111_v31 }
  0x86   :  { %v118_v36 = vsel %vm523_vm7, %v116_v35, %v98_v33  ;;  %v117_v37 = vsel %vm527_vm8, %v115_v34, %v97_v32 }
  0x87   :  { %164 = vmatprep.subr.mxu0 %v118_v36 }
  0x88   :  { %v77_v38 = vpop.permute.xlu1 %76  ;;  %165 = vmatpush1.msra.mxu0 %v117_v37  ;;  %v75_v39 = vpop.permute.xlu0 %74 }
  0x89   :  { %v79_v40 = vsel %vm78_vm9, %v75_v39, %v77_v38  ;;  %v80_v41 = vsel %vm78_vm9, %v77_v38, %v75_v39 }
  0x8a   :  { %v109_v42 = vsel %vm496_vm2, %v79_v40, %v107_v19  ;;  %v108_v43 = vsel %vm500_vm3, %v80_v41, %v106_v18 }
  0x8b   :  { %166 = vmatprep.subr.mxu0 %v109_v42 }
  0x8c   :  { %v61_v44 = vpop.permute.xlu1 %60  ;;  %167 = vmatpush1.msra.mxu0 %v108_v43  ;;  %v59_v45 = vpop.permute.xlu0 %58 }
  0x8d   :  { %v63_v46 = vsel %vm62_vm10, %v59_v45, %v61_v44  ;;  %v64_v47 = vsel %vm62_vm10, %v61_v44, %v59_v45  ;;  %168 = vmatprep.subr.mxu0 %v449_v1 }
  0x8e   :  { %169 = vmatpush1.msra.mxu0 %v440_v0  ;;  %v100_v48 = vsel %vm523_vm7, %v98_v33, %v63_v46  ;;  %v99_v49 = vsel %vm527_vm8, %v97_v32, %v64_v47 }
  0x8f   :  { %170 = vmatprep.subr.mxu0 %v100_v48 }
  0x90   :  { %v86_v50 = vpop.permute.xlu1 %85  ;;  %171 = vmatpush1.msra.mxu0 %v99_v49  ;;  %v84_v51 = vpop.permute.xlu0 %83 }
  0x91   :  { %v88_v52 = vsel %vm87_vm11, %v84_v51, %v86_v50  ;;  %v89_v53 = vsel %vm87_vm11, %v86_v50, %v84_v51 }
  0x92   :  { %v91_v54 = vsel %vm496_vm2, %v88_v52, %v79_v40  ;;  %v90_v55 = vsel %vm500_vm3, %v89_v53, %v80_v41 }
  0x93   :  { %172 = vmatprep.subr.mxu0 %v91_v54 }
  0x94   :  { %v70_v56 = vpop.permute.xlu1 %69  ;;  %173 = vmatpush1.msra.mxu0 %v90_v55  ;;  %v68_v57 = vpop.permute.xlu0 %67 }
  0x95   :  { %v72_v58 = vsel %vm71_vm12, %v68_v57, %v70_v56  ;;  %v73_v59 = vsel %vm71_vm12, %v70_v56, %v68_v57 }
  0x96   :  { %174 = vmatprep.subr.mxu0 %v72_v58 }
  0x97   :  { %175 = vmatpush1.msra.mxu0 %v73_v59 }
  0x98   :  { %v52_v60 = vpop.permute.xlu1 %51  ;;  %v50_v61 = vpop.permute.xlu0 %49 }
  0x99   :  { %v54_v62 = vsel %vm53_vm13, %v50_v61, %v52_v60  ;;  %v55_v63 = vsel %vm53_vm13, %v52_v60, %v50_v61 }
  0x9a   :  { %v66_v2 = vsel %vm523_vm7, %v63_v46, %v54_v62  ;;  %v65_v3 = vsel %vm527_vm8, %v64_v47, %v55_v63 }
  0x9b   :  { %176 = vmatprep.subr.mxu0 %v66_v2 }
  0x9c   :  { %177 = vmatpush1.msra.mxu0 %v65_v3 }
  0x9d   :  { %380 = vmatmul.mubr.msk.f32.vlgmr.msra.gmra.mxu0 %vm142_vm14, %v135_v4 }
  0xa5   :  { %v140_v5 = vpop.permute.xlu0 %139 }
 0x15d   :  { %v212_v7 = vpop.f32.mrf.mxu0 }
 0x15e   :  { %v213_v8 = vadd.f32 %v212_v7, %v140_v5  ;;  %v291_v7 = vld [vmem:[%s719_s3] sm:$0xff] }
 0x15f   :  { %v214_v9 = vpop.f32.mrf.mxu0 }
 0x160   :  { %v590_v10 = vmax.f32 %v213_v8, 0.0  ;;  %v215_v11 = vadd.f32 %v214_v9, %v140_v5 }
 0x162   :  { %283 = vrot.lane.b32.xlu0 %v590_v10, %s395_s20  ;;  %261 = vrot.lane.b32.xlu1 %v590_v10, %s396_s21  ;;  %v596_v14 = vmax.f32 %v215_v11, 0.0 }
 0x166   :  { %277 = vrot.lane.b32.xlu0 %v590_v10, %s397_s24  ;;  %263 = vrot.lane.b32.xlu1 %v596_v14, %s396_s21 }
 0x16a   :  { %253 = vrot.lane.b32.xlu0 %v590_v10, %s398_s25  ;;  %285 = vrot.lane.b32.xlu1 %v596_v14, %s395_s20 }
 0x16e   :  { %269 = vrot.lane.b32.xlu0 %v590_v10, %s399_s0  ;;  %279 = vrot.lane.b32.xlu1 %v596_v14, %s397_s24 }
 0x172   :  { %239 = vrot.lane.b32.xlu0 %v590_v10, %s400_s26  ;;  %255 = vrot.lane.b32.xlu1 %v596_v14, %s398_s25 }
 0x176   :  { %225 = vrot.lane.b32.xlu0 %v590_v10, %s401_s27  ;;  %271 = vrot.lane.b32.xlu1 %v596_v14, %s399_s0 }
 0x17a   :  { %245 = vrot.lane.b32.xlu0 %v590_v10, %s403_s28  ;;  %241 = vrot.lane.b32.xlu1 %v596_v14, %s400_s26 }
 0x17e   :  { %233 = vrot.lane.b32.xlu0 %v590_v10, %s405_s29  ;;  %227 = vrot.lane.b32.xlu1 %v596_v14, %s401_s27 }
 0x182   :  { %219 = vrot.lane.b32.xlu0 %v590_v10, %s406_s30  ;;  %247 = vrot.lane.b32.xlu1 %v596_v14, %s403_s28 }
 0x186   :  { %295 = vperm.xlu0 %394, %v292_v15   ;;  %235 = vrot.lane.b32.xlu1 %v596_v14, %s405_s29 }
 0x18a   :  { %221 = vrot.lane.b32.xlu1 %v596_v14, %s406_s30 }
 0x1d4   :  { %v284_v16 = vpop.permute.xlu0 %283  ;;  %v262_v17 = vpop.permute.xlu1 %261 }
 0x1d8   :  { %v278_v18 = vpop.permute.xlu0 %277  ;;  %v264_v19 = vpop.permute.xlu1 %263 }
 0x1d9   :  { %v265_v22 = vsel %vm105_vm1, %v262_v17, %v264_v19  ;;  %v266_v23 = vsel %vm105_vm1, %v264_v19, %v262_v17 }
 0x1dc   :  { %v254_v20 = vpop.permute.xlu0 %253  ;;  %v286_v21 = vpop.permute.xlu1 %285 }
 0x1dd   :  { %v287_v24 = vsel %vm130_vm0, %v284_v16, %v286_v21  ;;  %v288_v25 = vsel %vm130_vm0, %v286_v21, %v284_v16 }
 0x1de   :  { %v290_v26 = vsel %vm496_vm2, %v266_v23, %v288_v25  ;;  %v289_v27 = vsel %vm500_vm3, %v265_v22, %v287_v24 }
 0x1df   :  { %315 = vmatprep.subr.mxu1 %v290_v26 }
 0x1e0   :  { %v270_v30 = vpop.permute.xlu0 %269  ;;  %316 = vmatpush1.msra.mxu1 %v289_v27  ;;  %v280_v31 = vpop.permute.xlu1 %279 }
 0x1e1   :  { %v282_v32 = vsel %vm123_vm4, %v280_v31, %v278_v18  ;;  %v281_v33 = vsel %vm123_vm4, %v278_v18, %v280_v31 }
 0x1e2   :  { %317 = vmatprep.subr.mxu1 %v282_v32 }
 0x1e3   :  { %318 = vmatpush1.msra.mxu1 %v281_v33 }
 0x1e4   :  { %v240_v34 = vpop.permute.xlu0 %239  ;;  %v256_v35 = vpop.permute.xlu1 %255 }
 0x1e5   :  { %v257_v37 = vsel %vm96_vm5, %v254_v20, %v256_v35  ;;  %v258_v38 = vsel %vm96_vm5, %v256_v35, %v254_v20 }
 0x1e8   :  { %v272_v36 = vpop.permute.xlu1 %271  ;;  %v226_v41 = vpop.permute.xlu0 %225 }
 0x1e9   :  { %v273_v39 = vsel %vm114_vm6, %v270_v30, %v272_v36  ;;  %v274_v40 = vsel %vm114_vm6, %v272_v36, %v270_v30 }
 0x1ea   :  { %v276_v42 = vsel %vm523_vm7, %v274_v40, %v258_v38  ;;  %v275_v43 = vsel %vm527_vm8, %v273_v39, %v257_v37 }
 0x1eb   :  { %319 = vmatprep.subr.mxu1 %v276_v42 }
 0x1ec   :  { %320 = vmatpush1.msra.mxu1 %v275_v43  ;;  %v242_v44 = vpop.permute.xlu1 %241  ;;  %v246_v49 = vpop.permute.xlu0 %245 }
 0x1ed   :  { %v243_v45 = vsel %vm78_vm9, %v240_v34, %v242_v44  ;;  %v244_v46 = vsel %vm78_vm9, %v242_v44, %v240_v34 }
 0x1ee   :  { %v268_v47 = vsel %vm496_vm2, %v243_v45, %v266_v23  ;;  %v267_v48 = vsel %vm500_vm3, %v244_v46, %v265_v22 }
 0x1ef   :  { %321 = vmatprep.subr.mxu1 %v268_v47 }
 0x1f0   :  { %322 = vmatpush1.msra.mxu1 %v267_v48  ;;  %v228_v50 = vpop.permute.xlu1 %227  ;;  %v234_v58 = vpop.permute.xlu0 %233 }
 0x1f1   :  { %v229_v51 = vsel %vm62_vm10, %v226_v41, %v228_v50  ;;  %v230_v52 = vsel %vm62_vm10, %v228_v50, %v226_v41  ;;  %323 = vmatprep.subr.mxu1 %v596_v14 }
 0x1f2   :  { %324 = vmatpush1.msra.mxu1 %v590_v10  ;;  %v260_v53 = vsel %vm523_vm7, %v258_v38, %v229_v51  ;;  %v259_v54 = vsel %vm527_vm8, %v257_v37, %v230_v52 }
 0x1f3   :  { %325 = vmatprep.subr.mxu1 %v260_v53 }
 0x1f4   :  { %326 = vmatpush1.msra.mxu1 %v259_v54  ;;  %v248_v55 = vpop.permute.xlu1 %247  ;;  %v220_v2 = vpop.permute.xlu0 %219 }
 0x1f5   :  { %v249_v56 = vsel %vm87_vm11, %v246_v49, %v248_v55  ;;  %v250_v57 = vsel %vm87_vm11, %v248_v55, %v246_v49 }
 0x1f6   :  { %v252_v59 = vsel %vm496_vm2, %v249_v56, %v243_v45  ;;  %v251_v60 = vsel %vm500_vm3, %v250_v57, %v244_v46 }
 0x1f7   :  { %327 = vmatprep.subr.mxu1 %v252_v59 }
 0x1f8   :  { %328 = vmatpush1.msra.mxu1 %v251_v60  ;;  %v236_v61 = vpop.permute.xlu1 %235 }
 0x1f9   :  { %v237_v62 = vsel %vm71_vm12, %v234_v58, %v236_v61  ;;  %v238_v63 = vsel %vm71_vm12, %v236_v61, %v234_v58 }
 0x1fa   :  { %329 = vmatprep.subr.mxu1 %v237_v62 }
 0x1fb   :  { %330 = vmatpush1.msra.mxu1 %v238_v63 }
 0x1fc   :  { %v222_v3 = vpop.permute.xlu1 %221 }
 0x1fd   :  { %v223_v12 = vsel %vm53_vm13, %v220_v2, %v222_v3  ;;  %v224_v13 = vsel %vm53_vm13, %v222_v3, %v220_v2 }
 0x1fe   :  { %v232_v4 = vsel %vm523_vm7, %v229_v51, %v223_v12  ;;  %v231_v5 = vsel %vm527_vm8, %v230_v52, %v224_v13 }
 0x1ff   :  { %331 = vmatprep.subr.mxu1 %v232_v4 }
 0x200   :  { %332 = vmatpush1.msra.mxu1 %v231_v5 }
 0x201   :  { %381 = vmatmul.mubr.msk.f32.vlgmr.msra.gmra.mxu1 %vm142_vm14, %v291_v7  ;;  %v296_v8 = vpop.permute.xlu0 %295 }
 0x2c1   :  { %v367_v9 = vpop.f32.mrf.mxu1 }
 0x2c2   :  { %v368_v10 = vadd.f32 %v367_v9, %v296_v8 }
 0x2c3   :  { %v369_v11 = vpop.f32.mrf.mxu1 }
 0x2c4   :  { %v372_v6 = vadd.f32 %v368_v10, %v440_v0  ;;  %v370_v14 = vadd.f32 %v369_v11, %v296_v8 }
 0x2c6   :  { %374 = vst [vmem:[%s720_s5] sm:$0xff] %v372_v6  ;;  %v373_v28 = vadd.f32 %v370_v14, %v449_v1 }
 0x2c8   :  { %375 = vst [vmem:[%s720_s5 + $0x8] sm:$0xff] %v373_v28 }

</bundles_post_ra>
